<compile_context>
chip_gen: v7x
topology: tpu7x:2x2x1
jax: 0.10.0
libtpu: 0.0.40
codegen_flags: <defaults>
</compile_context>

<pallas_src>
import jax
import jax.numpy as jnp
from jax.experimental import pallas as pl
from jax.experimental.pallas import tpu as pltpu


def _upsample_kernel(x_ref, w_ref, b_ref, o_ref):
    # x_ref: (1, TH, W, Cin)        bf16 input row-tile
    # w_ref: (Cin, 2*Cout)          bf16 weight, BN-scale folded, columns duplicated
    # b_ref: (1, 2*Cout)            f32 folded BN bias (duplicated)
    # o_ref: (1, 2*TH, W, 2*Cout)   bf16 output tile
    x = x_ref[0]                                   # (TH, W, Cin)
    TH, W, Cin = x.shape
    C2 = w_ref.shape[1]                            # 2 * Cout

    # 1x1 conv == matmul over channels (MXU, f32 accumulate).  Duplicated weight
    # columns make each pixel emit [y, y] along the lane dim == width-2x nearest.
    xf = x.reshape(TH * W, Cin)
    y = jnp.dot(xf, w_ref[...], preferred_element_type=jnp.float32)  # (TH*W, C2)

    # Fused BN bias + ReLU6, then cast once to the bf16 output dtype.
    y = jnp.clip(y + b_ref[...], 0.0, 6.0).astype(o_ref.dtype)

    # Free sublane view (W % 8 == 0 guaranteed by the wrapper padding).
    y3 = y.reshape(TH, W, C2)                      # (TH, W, 2*Cout)

    # Height 2x: duplicate whole (W, C2) sublane/lane tiles along a new size-2
    # axis and merge it into 2*TH -- pure block duplication, no lane movement.
    out = jnp.broadcast_to(y3[:, None], (TH, 2, W, C2))
    o_ref[0] = out.reshape(2 * TH, W, C2)


def _vmem_budget_and_limit():
    """Dispatch tiling budget / vmem limit on the detected part.  v7x has only
    64 MiB VMEM per TC (32 MiB scoped default); v5e/v6e have 128 MiB."""
    phys = None
    try:
        phys = getattr(pltpu.get_tpu_info(), "vmem_capacity_bytes", None)
    except Exception:
        phys = None
    if phys is not None and phys > 96 * 1024 * 1024:
        return 48 * 1024 * 1024, 96 * 1024 * 1024   # 128-MiB parts: bigger tiles
    return 20 * 1024 * 1024, 32 * 1024 * 1024       # v7x-safe default


def _pick_tile_h(N, H, W, Cin, Cout, budget_bytes):
    """Pick the row-tile TH: divides H, fits (double-buffered I/O + in-kernel
    f32 intermediates + weight/bias buffers) within `budget_bytes`, and prefers
    >= 4 total grid steps so both v7x TensorCores stay pipelined."""
    C2 = 2 * Cout

    def vmem_bytes(th):
        in_b = th * W * Cin * 2                    # bf16 input tile
        out_b = 2 * th * W * C2 * 2                # bf16 output tile
        tmp_b = 2 * th * W * C2 * 4                # f32 matmul / clip intermediates
        wgt_b = Cin * C2 * 2 + C2 * 4              # bf16 weight + f32 bias
        return 2 * (in_b + out_b + wgt_b) + tmp_b  # double-buffered I/O + temps

    divs = [th for th in range(H, 0, -1) if H % th == 0]   # descending
    fitting = [th for th in divs if vmem_bytes(th) <= budget_bytes] or [1]
    for th in fitting:                             # largest tile with >= 4 steps
        if N * (H // th) >= 4:
            return th
    return fitting[0]                              # else largest fitting tile


def upsample_forward(x_nchw, w, gamma, beta, running_mean, running_var, eps=1e-5):
    """Upsample module: BasicConv(Cin, Cout, 1) + BN + ReLU6, then nearest 2x.
    x_nchw: (N, Cin, H, W) f32.  Returns (N, Cout, 2H, 2W) bf16."""
    N, Cin, H, W = x_nchw.shape
    Cout = w.shape[0]
    C2 = 2 * Cout

    # --- wrapper-side folding (tiny XLA ops) ---
    scale = gamma / jnp.sqrt(running_var + eps)              # (Cout,)
    bias = beta - running_mean * scale                       # (Cout,)
    w_fold = w.reshape(Cout, Cin).T * scale[None, :]         # (Cin, Cout), BN folded
    # Duplicate output channels -> matmul directly produces width-2x pattern.
    # TODO(synk): for real MobileNetV3 channel counts, pad Cin toward 128 and
    # keep 2*Cout a multiple of 128 for full MXU width / unmasked stores.
    w_dup = jnp.concatenate([w_fold, w_fold], axis=1).astype(jnp.bfloat16)  # (Cin, C2)
    b_dup = jnp.concatenate([bias, bias]).reshape(1, C2).astype(jnp.float32)

    # Glue: NCHW -> NHWC + bf16.  (In an NHWC pipeline these transposes vanish.)
    x_nhwc = jnp.transpose(x_nchw, (0, 2, 3, 1)).astype(jnp.bfloat16)

    # Pad W to a multiple of 8 so the in-kernel (TH*W, C2)->(TH, W, C2) reshape
    # stays a free sublane view (needed for 13/26-sized YOLO grids).
    Wp = ((W + 7) // 8) * 8
    if Wp != W:
        x_nhwc = jnp.pad(x_nhwc, ((0, 0), (0, 0), (0, Wp - W), (0, 0)))

    budget, vmem_limit = _vmem_budget_and_limit()
    TH = _pick_tile_h(N, H, Wp, Cin, Cout, budget)

    out4 = pl.pallas_call(
        _upsample_kernel,
        out_shape=jax.ShapeDtypeStruct((N, 2 * H, Wp, C2), jnp.bfloat16),
        grid_spec=pltpu.PrefetchScalarGridSpec(
            num_scalar_prefetch=0,
            grid=(N, H // TH),
            in_specs=[
                pl.BlockSpec((1, TH, Wp, Cin), lambda n, i: (n, i, 0, 0)),
                pl.BlockSpec((Cin, C2), lambda n, i: (0, 0)),
                pl.BlockSpec((1, C2), lambda n, i: (0, 0)),
            ],
            out_specs=pl.BlockSpec((1, 2 * TH, Wp, C2), lambda n, i: (n, i, 0, 0)),
        ),
        compiler_params=pltpu.CompilerParams(
            dimension_semantics=("parallel", "parallel"),
            vmem_limit_bytes=vmem_limit,
        ),
    )(x_nhwc, w_dup, b_dup)

    # (N, 2H, Wp, 2*Cout) -> (N, 2H, 2*Wp, Cout) is a free row-major view; slice
    # off the width padding, then NCHW for the PyTorch caller (on bf16 data).
    out_nhwc = out4.reshape(N, 2 * H, 2 * Wp, Cout)[:, :, :2 * W, :]
    return jnp.transpose(out_nhwc, (0, 3, 1, 2))


def _reference(x_nchw, w, gamma, beta, running_mean, running_var, eps=1e-5):
    # Pure-JAX reference of the same forward pass, mirroring the kernel's bf16
    # rounding of inputs / folded weights (f32 accumulate on both sides).
    N, Cin, H, W = x_nchw.shape
    Cout = w.shape[0]
    scale = gamma / jnp.sqrt(running_var + eps)
    bias = beta - running_mean * scale
    wq = (w.reshape(Cout, Cin) * scale[:, None]).astype(jnp.bfloat16).astype(jnp.float32)
    xq = x_nchw.astype(jnp.bfloat16).astype(jnp.float32)
    y = jnp.einsum("nchw,oc->nohw", xq, wq)
    y = jnp.clip(y + bias[None, :, None, None], 0.0, 6.0)
    y = jnp.repeat(jnp.repeat(y, 2, axis=2), 2, axis=3)
    return y


if __name__ == "__main__":
    key = jax.random.PRNGKey(0)
    k_x, k_w, k_g, k_b, k_m, k_v = jax.random.split(key, 6)

    N, Cin, Cout, H, W = 2, 4, 8, 16, 16

    x = jax.random.normal(k_x, (N, Cin, H, W), dtype=jnp.float32)
    # Conv2d(in, out, 1, bias=False) weight shape: (Cout, Cin, 1, 1)
    w = jax.random.normal(k_w, (Cout, Cin, 1, 1), dtype=jnp.float32) * 0.1
    gamma = jax.random.uniform(k_g, (Cout,), minval=0.5, maxval=1.5)
    beta = jax.random.normal(k_b, (Cout,)) * 0.1
    running_mean = jax.random.normal(k_m, (Cout,)) * 0.1
    running_var = jax.random.uniform(k_v, (Cout,), minval=0.5, maxval=1.5)

    out = upsample_forward(x, w, gamma, beta, running_mean, running_var)
    out = jax.block_until_ready(out)

    ref = _reference(x, w, gamma, beta, running_mean, running_var)
    assert out.shape == (N, Cout, 2 * H, 2 * W), out.shape
    out_f32 = out.astype(jnp.float32)
    err = float(jnp.max(jnp.abs(out_f32 - ref)))
    # bf16 output: values reach 6.0, so tolerance must cover bf16 rounding.
    assert jnp.allclose(out_f32, ref, atol=3e-2, rtol=2e-2), err

    print("KERNEL_OK")
</pallas_src>

<mosaic_0001>
module attributes {stable_mosaic.version = 11 : i64} {
  func.func @_upsample_kernel(%arg0: i32, %arg1: i32, %arg2: memref<1x8x16x4xbf16, #tpu.memory_space<vmem>>, %arg3: memref<4x16xbf16, #tpu.memory_space<vmem>>, %arg4: memref<1x16xf32, #tpu.memory_space<vmem>>, %arg5: memref<1x16x16x16xbf16, #tpu.memory_space<vmem>>) attributes {dimension_semantics = [#tpu.dimension_semantics<parallel>, #tpu.dimension_semantics<parallel>], iteration_bounds = array<i64: 2, 2>, scalar_prefetch = 0 : i64, scratch_operands = 0 : i64, tpu.core_type = #tpu.core_type<tc>, window_params = [{transform_indices = @transform_0, window_bounds = array<i64: 1, 8, 16, 4>}, {pipeline_mode = #tpu.pipeline_mode<synchronous>, transform_indices = @transform_1, window_bounds = array<i64: 4, 16>}, {pipeline_mode = #tpu.pipeline_mode<synchronous>, transform_indices = @transform_2, window_bounds = array<i64: 1, 16>}, {transform_indices = @transform_3, window_bounds = array<i64: 1, 16, 16, 16>}]} {
    %c0 = arith.constant 0 : index
    %c0_0 = arith.constant 0 : index
    %c0_1 = arith.constant 0 : index
    %c0_2 = arith.constant 0 : index
    %0 = vector.load %arg2[%c0, %c0_0, %c0_1, %c0_2] : memref<1x8x16x4xbf16, #tpu.memory_space<vmem>>, vector<1x8x16x4xbf16>
    %1 = vector.shape_cast %0 : vector<1x8x16x4xbf16> to vector<8x16x4xbf16>
    %2 = vector.shape_cast %1 : vector<8x16x4xbf16> to vector<128x4xbf16>
    %c0_3 = arith.constant 0 : index
    %c0_4 = arith.constant 0 : index
    %3 = vector.load %arg3[%c0_3, %c0_4] : memref<4x16xbf16, #tpu.memory_space<vmem>>, vector<4x16xbf16>
    %cst = arith.constant dense<0.000000e+00> : vector<128x16xf32>
    %4 = tpu.matmul %2, %3, %cst {dimension_numbers = #tpu.dot_dimension_numbers<[1], [0], [0], [1], [0, 0, 1, 1], [], []>} : vector<128x4xbf16>, vector<4x16xbf16>, vector<128x16xf32> -> vector<128x16xf32>
    %c0_5 = arith.constant 0 : index
    %c0_6 = arith.constant 0 : index
    %5 = vector.load %arg4[%c0_5, %c0_6] : memref<1x16xf32, #tpu.memory_space<vmem>>, vector<1x16xf32>
    %6 = vector.broadcast %5 : vector<1x16xf32> to vector<128x16xf32>
    %7 = arith.addf %4, %6 : vector<128x16xf32>
    %cst_7 = arith.constant 0.000000e+00 : f32
    %cst_8 = arith.constant 6.000000e+00 : f32
    %8 = vector.broadcast %cst_7 : f32 to vector<128x16xf32>
    %9 = arith.maximumf %8, %7 : vector<128x16xf32>
    %10 = vector.broadcast %cst_8 : f32 to vector<128x16xf32>
    %11 = arith.minimumf %10, %9 : vector<128x16xf32>
    %12 = arith.truncf %11 : vector<128x16xf32> to vector<128x16xbf16>
    %13 = vector.shape_cast %12 : vector<128x16xbf16> to vector<8x16x16xbf16>
    %14 = vector.shape_cast %13 : vector<8x16x16xbf16> to vector<8x1x16x16xbf16>
    %15 = vector.shape_cast %14 : vector<8x1x16x16xbf16> to vector<8x1x16x16xbf16>
    %16 = vector.broadcast %15 : vector<8x1x16x16xbf16> to vector<8x2x16x16xbf16>
    %17 = vector.shape_cast %16 : vector<8x2x16x16xbf16> to vector<16x16x16xbf16>
    %c0_9 = arith.constant 0 : index
    %c0_10 = arith.constant 0 : index
    %c0_11 = arith.constant 0 : index
    %c0_12 = arith.constant 0 : index
    %18 = vector.load %arg5[%c0_9, %c0_10, %c0_11, %c0_12] : memref<1x16x16x16xbf16, #tpu.memory_space<vmem>>, vector<1x16x16x16xbf16>
    %19 = vector.shape_cast %18 : vector<1x16x16x16xbf16> to vector<16x16x16xbf16>
    %20 = vector.shape_cast %17 : vector<16x16x16xbf16> to vector<1x16x16x16xbf16>
    tpu.vector_store %arg5[%c0_9, %c0_10, %c0_11, %c0_12], %20 {strides = array<i32>} : memref<1x16x16x16xbf16, #tpu.memory_space<vmem>>, vector<1x16x16x16xbf16>,
    return
  }
  func.func @transform_0(%arg0: i32, %arg1: i32) -> (i32, i32, i32, i32) {
    %c0_i32 = arith.constant 0 : i32
    %c0_i32_0 = arith.constant 0 : i32
    %c0_i32_1 = arith.constant 0 : i32
    return %arg0, %arg1, %c0_i32, %c0_i32_0 : i32, i32, i32, i32
  }
  func.func @transform_1(%arg0: i32, %arg1: i32) -> (i32, i32) {
    %c0_i32 = arith.constant 0 : i32
    %c0_i32_0 = arith.constant 0 : i32
    %c0_i32_1 = arith.constant 0 : i32
    return %c0_i32, %c0_i32_0 : i32, i32
  }
  func.func @transform_2(%arg0: i32, %arg1: i32) -> (i32, i32) {
    %c0_i32 = arith.constant 0 : i32
    %c0_i32_0 = arith.constant 0 : i32
    %c0_i32_1 = arith.constant 0 : i32
    return %c0_i32, %c0_i32_0 : i32, i32
  }
  func.func @transform_3(%arg0: i32, %arg1: i32) -> (i32, i32, i32, i32) {
    %c0_i32 = arith.constant 0 : i32
    %c0_i32_0 = arith.constant 0 : i32
    %c0_i32_1 = arith.constant 0 : i32
    return %arg0, %arg1, %c0_i32, %c0_i32_0 : i32, i32, i32, i32
  }
}

</mosaic_0001>

<bundles_post_ra>
// kernel: tpu_custom_call.1
= control target key start
LH: loop header
LB: loop body
LE: loop exit
PB: predicated region body
PF: predicated region fallthrough
CT: control target
= control target key end

     0   :  { %s837_s12 = smov 0   ;;  %s839_s13 = smov 0   ;;  %s994_s0 = inlined_call_operand.vmem [shape: bf16[2,16,16,4], index: 0, kind: input, shape index: {}]   ;;  %s995_s1 = inlined_call_operand.vmem [shape: bf16[4,16], index: 1, kind: input, shape index: {}]   ;;  %s996_s2 = inlined_call_operand.vmem [shape: f32[1,16], index: 2, kind: input, shape index: {}]   ;;  %s997_s3 = inlined_call_operand.vmem [shape: bf16[2,32,16,16], index: 3, kind: output, shape index: {}]  }
   0x1   :  { %s841_s14 = smov 0   ;;  %s843_s15 = smov 0  }
   0x2   :  { %s845_s16 = smov 0  }
   0x3 LB: > { %s22_s17 = sadd.s32 1, %s807_s14  ;;  %s25_s18 = sadd.s32 1, %s811_s15  ;;  %s815_s16 = sphi %s845_s16, %s13_s16   ;;  %s811_s15 = sphi %s843_s15, %s1001_s15   ;;  %s807_s14 = sphi %s841_s14, %s1000_s14   ;;  %s803_s13 = sphi %s839_s13, %s999_s13   ;;  %s799_s12 = sphi %s837_s12, %s998_s12  }
   0x4   : > { %p23_p0 = scmp.ge.s32.totalorder %s22_s17, 2  ;;  %p638_p1 = scmp.ge.s32.totalorder %s815_s16, 1 }
   0x5   : > { %p159_p2 = scmp.lt.s32.totalorder %s815_s16, 5 }
   0x6   : > { %s1003_s17 = smov (%p23_p0, %s22_s17), 0  ;;  %s1005_s18 = smov (!%p23_p0, %s25_s18), %s811_s15 }
   0x7   : > { %p160_p3 = pnand %p638_p1, %p159_p2  ;;  %p27_p4 = scmp.ge.s32.totalorder %s1005_s18, 2 }
   0x8   : > { %v232_v0 = vld [vmem:[%s995_s1] sm:$0x3] (!%p160_p3)  ;;  %vm305_vm0 = vcmask (!%p160_p3), 1041408   ;;  %s639_s21 = sshll.u32 (!%p160_p3), %s799_s12, 3  ;;  %p194_p5 = scmp.lt.s32.totalorder (!%p160_p3), %s803_s13, 1  ;;  %vm280_vm1 = vcmask (!%p160_p3), 31744  }
   0x9   : > { %s1007_s18 = smov (%p27_p4, %s1005_s18), 0  ;;  %163 = sbr.rel (%p160_p3) target bundleno = 261 (0x105), region = 32 }
   0xa   : > { %727 = vmatprep.subr.msk.bf16.mxu0 (!%p160_p3), %vm305_vm0, %v232_v0  ;;  %728 = vmatprep.subr.msk.bf16.mxu1 (!%p160_p3), %vm305_vm0, %v232_v0  ;;  %v307_v1 = vsel (!%p160_p3), %vm305_vm0, %v232_v0, 0  ;;  %p196_p6 = scmp.lt.s32.totalorder (!%p160_p3), %s639_s21, 15  ;;  %s643_s29 = sshll.u32 (!%p160_p3), %s799_s12, 4  ;;  %v892_v10 = vld [vmem:[%s996_s2] ss:$0 sm:$0xff] (!%p160_p3)  ;;  %vm502_vm2 = vcmask (!%p160_p3), 125952  }
   0xb   : > { %708 = vmatpush3.bf16.msra.mxu0 (!%p160_p3), %v307_v1  ;;  %726 = vmatpush3.bf16.msra.mxu1 (!%p160_p3), %v307_v1  ;;  %p207_p7 = scmp.lt.s32.totalorder (!%p160_p3), %s643_s29, 31 }
  0x10   : > { %s1009_s13 = smov (!%p194_p5, %s803_s13), 1  ;;  %s1011_s21 = smov (!%p196_p6, %s639_s21), 15 }
  0x11   : > { %s641_s22 = sshll.u32 %s1009_s13, 5  ;;  %s640_s23 = sshll.u32 %s1011_s21, 1 }
  0x12   : > { %s200_s24 = sadd.s32 %s641_s22, %s640_s23  ;;  %s1013_s29 = smov (!%p207_p7, %s643_s29), 31 }
  0x13   : > { %s642_s25 = sshll.u32 %s200_s24, 2  ;;  %s644_s30 = sshll.u32 %s1013_s29, 1 }
  0x14   : > { %s202_s28 = scalar_lea.vmem %s994_s0, %s642_s25  ;;  %s645_s4 = sshll.u32 %s1009_s13, 6 }
  0x15   : > { %v769_v2 = vld [vmem:[%s202_s28] sm:$0xff]   ;;  %v771_v4 = vld [vmem:[%s202_s28 + $0x8] sm:$0xff]   ;;  %v773_v6 = vld [vmem:[%s202_s28 + $0x10] sm:$0xff]   ;;  %s211_s7 = sadd.s32 %s645_s4, %s644_s30 }
  0x16   : > { %v770_v3 = vld [vmem:[%s202_s28 + $0x20] sm:$0xff]   ;;  %709 = vmatprep.mubr.msk.bf16.mxu0 %vm280_vm1, %v769_v2  ;;  %v772_v5 = vld [vmem:[%s202_s28 + $0x28] sm:$0xff]   ;;  %v774_v7 = vld [vmem:[%s202_s28 + $0x30] sm:$0xff]   ;;  %s646_s8 = sshll.u32 %s211_s7, 2 }
  0x17   : > { %717 = vmatprep.mubr.msk.bf16.mxu1 %vm280_vm1, %v770_v3  ;;  %710 = vmatmul.mubr.msk.bf16.vlgmr.msra.gmra.mrb[0].mxu0 %vm280_vm1, %v771_v4  ;;  %v775_v8 = vld [vmem:[%s202_s28 + $0x18] sm:$0xff]   ;;  %s905_s11 = scalar_lea.vmem %s997_s3, %s646_s8 }
  0x18   : > { %718 = vmatmul.mubr.msk.bf16.vlgmr.msra.gmra.mrb[0].mxu1 %vm280_vm1, %v772_v5  ;;  %713 = vmatprep.mubr.msk.bf16.mxu0 %vm280_vm1, %v773_v6  ;;  %v776_v9 = vld [vmem:[%s202_s28 + $0x38] sm:$0xff]  }
  0x19   : > { %721 = vmatprep.mubr.msk.bf16.mxu1 %vm280_vm1, %v774_v7 }
  0x1f   : > { %714 = vmatmul.mubr.msk.bf16.gmra.mrb[4].mxu0 %vm280_vm1, %v775_v8 }
  0x20   : > { %722 = vmatmul.mubr.msk.bf16.gmra.mrb[4].mxu1 %vm280_vm1, %v776_v9 }
  0xea   : > { %v711_v11 = vpop.f32.mrb[0].mxu0 }
  0xeb   : > { %v352_v12 = vadd.f32 %v711_v11, %v892_v10  ;;  %v719_v13 = vpop.f32.mrb[0].mxu1  ;;  %v343_v14 = vpop.f32.mrb[1].mxu0 }
  0xec   : > { %v384_v15 = vadd.f32 %v719_v13, %v892_v10  ;;  %v344_v16 = vadd.f32 %v892_v10, %v343_v14  ;;  %v375_v17 = vpop.f32.mrb[1].mxu1  ;;  %v712_v18 = vpop.f32.mrb[2].mxu0 }
  0xed   : > { %v408_v19 = vmax.f32 %v352_v12, 0.0  ;;  %v376_v20 = vadd.f32 %v892_v10, %v375_v17  ;;  %v355_v21 = vadd.f32 %v712_v18, %v892_v10  ;;  %v720_v22 = vpop.f32.mrb[2].mxu1  ;;  %v346_v23 = vpop.f32.mrb[3].mxu0 }
  0xee   : > { %v416_v24 = vmax.f32 %v384_v15, 0.0  ;;  %v406_v25 = vmax.f32 %v344_v16, 0.0  ;;  %v387_v26 = vadd.f32 %v720_v22, %v892_v10  ;;  %v347_v27 = vadd.f32 %v892_v10, %v346_v23  ;;  %v378_v28 = vpop.f32.mrb[3].mxu1 }
  0xef   : > { %v424_v29 = vmin.f32 %v408_v19, 6.0  ;;  %v414_v30 = vmax.f32 %v376_v20, 0.0  ;;  %v409_v31 = vmax.f32 %v355_v21, 0.0  ;;  %v379_v32 = vadd.f32 %v892_v10, %v378_v28 }
  0xf0   : > { %v432_v33 = vmin.f32 %v416_v24, 6.0  ;;  %v422_v34 = vmin.f32 %v406_v25, 6.0  ;;  %v417_v35 = vmax.f32 %v387_v26, 0.0  ;;  %v407_v36 = vmax.f32 %v347_v27, 0.0 }
  0xf1   : > { %v684_v37 = vpack.c.bf16 %v424_v29, %v424_v29  ;;  %v430_v38 = vmin.f32 %v414_v30, 6.0  ;;  %v425_v39 = vmin.f32 %v409_v31, 6.0  ;;  %v415_v40 = vmax.f32 %v379_v32, 0.0 }
  0xf2   : > { %v692_v41 = vpack.c.bf16 %v432_v33, %v432_v33  ;;  %v682_v42 = vpack.c.bf16 %v422_v34, %v422_v34  ;;  %v433_v43 = vmin.f32 %v417_v35, 6.0  ;;  %v423_v44 = vmin.f32 %v407_v36, 6.0  ;;  %v715_v45 = vpop.f32.mrb[4].mxu0 }
  0xf3   : > { %507 = vst.msk [vmem:[%s905_s11 + $0x10] sm:$0xf] %vm502_vm2, %v684_v37  ;;  %509 = vst.msk [vmem:[%s905_s11 + $0x18] sm:$0xf] %vm502_vm2, %v684_v37  ;;  %v690_v46 = vpack.c.bf16 %v430_v38, %v430_v38  ;;  %v685_v47 = vpack.c.bf16 %v425_v39, %v425_v39  ;;  %v431_v48 = vmin.f32 %v415_v40, 6.0  ;;  %v368_v49 = vadd.f32 %v715_v45, %v892_v10  ;;  %v723_v50 = vpop.f32.mrb[4].mxu1 }
  0xf4   : > { %v359_v51 = vpop.f32.mrb[5].mxu0  ;;  %523 = vst.msk [vmem:[%s905_s11 + $0x50] sm:$0xf] %vm502_vm2, %v692_v41  ;;  %525 = vst.msk [vmem:[%s905_s11 + $0x58] sm:$0xf] %vm502_vm2, %v692_v41  ;;  %v693_v52 = vpack.c.bf16 %v433_v43, %v433_v43  ;;  %v683_v53 = vpack.c.bf16 %v423_v44, %v423_v44  ;;  %v400_v54 = vadd.f32 %v723_v50, %v892_v10  ;;  %v391_v56 = vpop.f32.mrb[5].mxu1 }
  0xf5   : > { %503 = vst.msk [vmem:[%s905_s11] sm:$0xf] %vm502_vm2, %v682_v42  ;;  %505 = vst.msk [vmem:[%s905_s11 + $0x8] sm:$0xf] %vm502_vm2, %v682_v42  ;;  %v360_v55 = vadd.f32 %v892_v10, %v359_v51  ;;  %v716_v57 = vpop.f32.mrb[6].mxu0  ;;  %v691_v58 = vpack.c.bf16 %v431_v48, %v431_v48  ;;  %v412_v59 = vmax.f32 %v368_v49, 0.0  ;;  %v392_v60 = vadd.f32 %v892_v10, %v391_v56 }
  0xf6   : > { %519 = vst.msk [vmem:[%s905_s11 + $0x40] sm:$0xf] %vm502_vm2, %v690_v46  ;;  %521 = vst.msk [vmem:[%s905_s11 + $0x48] sm:$0xf] %vm502_vm2, %v690_v46  ;;  %v371_v61 = vadd.f32 %v716_v57, %v892_v10  ;;  %v724_v62 = vpop.f32.mrb[6].mxu1  ;;  %v362_v63 = vpop.f32.mrb[7].mxu0 }
  0xf7   : > { %508 = vst.msk [vmem:[%s905_s11 + $0x14] sm:$0xf] %vm502_vm2, %v685_v47  ;;  %510 = vst.msk [vmem:[%s905_s11 + $0x1c] sm:$0xf] %vm502_vm2, %v685_v47  ;;  %v420_v0 = vmax.f32 %v400_v54, 0.0  ;;  %v410_v1 = vmax.f32 %v360_v55, 0.0  ;;  %v403_v2 = vadd.f32 %v724_v62, %v892_v10  ;;  %v363_v3 = vadd.f32 %v892_v10, %v362_v63 }
  0xf8   : > { %524 = vst.msk [vmem:[%s905_s11 + $0x54] sm:$0xf] %vm502_vm2, %v693_v52  ;;  %526 = vst.msk [vmem:[%s905_s11 + $0x5c] sm:$0xf] %vm502_vm2, %v693_v52  ;;  %v394_v4 = vpop.f32.mrb[7].mxu1  ;;  %v428_v5 = vmin.f32 %v412_v59, 6.0 }
  0xf9   : > { %504 = vst.msk [vmem:[%s905_s11 + $0x4] sm:$0xf] %vm502_vm2, %v683_v53  ;;  %506 = vst.msk [vmem:[%s905_s11 + $0xc] sm:$0xf] %vm502_vm2, %v683_v53  ;;  %v418_v6 = vmax.f32 %v392_v60, 0.0  ;;  %v413_v7 = vmax.f32 %v371_v61, 0.0  ;;  %v395_v8 = vadd.f32 %v892_v10, %v394_v4 }
  0xfa   : > { %520 = vst.msk [vmem:[%s905_s11 + $0x44] sm:$0xf] %vm502_vm2, %v691_v58  ;;  %522 = vst.msk [vmem:[%s905_s11 + $0x4c] sm:$0xf] %vm502_vm2, %v691_v58  ;;  %v436_v9 = vmin.f32 %v420_v0, 6.0  ;;  %v426_v11 = vmin.f32 %v410_v1, 6.0  ;;  %v688_v14 = vpack.c.bf16 %v428_v5, %v428_v5 }
  0xfb   : > { %v421_v12 = vmax.f32 %v403_v2, 0.0  ;;  %v411_v13 = vmax.f32 %v363_v3, 0.0  ;;  %v434_v15 = vmin.f32 %v418_v6, 6.0  ;;  %v429_v16 = vmin.f32 %v413_v7, 6.0 }
  0xfc   : > { %v419_v17 = vmax.f32 %v395_v8, 0.0  ;;  %v696_v18 = vpack.c.bf16 %v436_v9, %v436_v9  ;;  %v686_v19 = vpack.c.bf16 %v426_v11, %v426_v11  ;;  %515 = vst.msk [vmem:[%s905_s11 + $0x30] sm:$0xf] %vm502_vm2, %v688_v14  ;;  %517 = vst.msk [vmem:[%s905_s11 + $0x38] sm:$0xf] %vm502_vm2, %v688_v14 }
  0xfd   : > { %v437_v20 = vmin.f32 %v421_v12, 6.0  ;;  %v427_v10 = vmin.f32 %v411_v13, 6.0  ;;  %v694_v21 = vpack.c.bf16 %v434_v15, %v434_v15  ;;  %v689_v22 = vpack.c.bf16 %v429_v16, %v429_v16 }
  0xfe   : > { %v435_v23 = vmin.f32 %v419_v17, 6.0  ;;  %531 = vst.msk [vmem:[%s905_s11 + $0x70] sm:$0xf] %vm502_vm2, %v696_v18  ;;  %533 = vst.msk [vmem:[%s905_s11 + $0x78] sm:$0xf] %vm502_vm2, %v696_v18 }
  0xff   : > { %511 = vst.msk [vmem:[%s905_s11 + $0x20] sm:$0xf] %vm502_vm2, %v686_v19  ;;  %513 = vst.msk [vmem:[%s905_s11 + $0x28] sm:$0xf] %vm502_vm2, %v686_v19  ;;  %v697_v24 = vpack.c.bf16 %v437_v20, %v437_v20  ;;  %v687_v25 = vpack.c.bf16 %v427_v10, %v427_v10 }
 0x100   : > { %527 = vst.msk [vmem:[%s905_s11 + $0x60] sm:$0xf] %vm502_vm2, %v694_v21  ;;  %529 = vst.msk [vmem:[%s905_s11 + $0x68] sm:$0xf] %vm502_vm2, %v694_v21  ;;  %v695_v26 = vpack.c.bf16 %v435_v23, %v435_v23 }
 0x101   : > { %516 = vst.msk [vmem:[%s905_s11 + $0x34] sm:$0xf] %vm502_vm2, %v689_v22  ;;  %518 = vst.msk [vmem:[%s905_s11 + $0x3c] sm:$0xf] %vm502_vm2, %v689_v22 }
 0x102   : > { %532 = vst.msk [vmem:[%s905_s11 + $0x74] sm:$0xf] %vm502_vm2, %v697_v24  ;;  %534 = vst.msk [vmem:[%s905_s11 + $0x7c] sm:$0xf] %vm502_vm2, %v697_v24 }
 0x103   : > { %512 = vst.msk [vmem:[%s905_s11 + $0x24] sm:$0xf] %vm502_vm2, %v687_v25  ;;  %514 = vst.msk [vmem:[%s905_s11 + $0x2c] sm:$0xf] %vm502_vm2, %v687_v25 }
 0x104   : > { %528 = vst.msk [vmem:[%s905_s11 + $0x64] sm:$0xf] %vm502_vm2, %v695_v26  ;;  %530 = vst.msk [vmem:[%s905_s11 + $0x6c] sm:$0xf] %vm502_vm2, %v695_v26 }
 0x105 PF: > { %s13_s16 = sadd.s32 1, %s815_s16   ;;  %s998_s12 = smov %s807_s14 }
 0x106   : > { %p10_p8 = scmp.ge.s32.totalorder %s13_s16, 6   ;;  %s999_s13 = smov %s811_s15 }
 0x107   : > { %s1000_s14 = smov %s1003_s17  ;;  %s1001_s15 = smov %s1007_s18 }
 0x108   :  { %12 = sbr.rel (!%p10_p8) target bundleno = 3 (0x3), region = 62 }

</bundles_post_ra>
